<compile_context>
chip_gen: v5e
topology: v5e:2x2
jax: 0.10.0
libtpu: 0.0.40
codegen_flags: <defaults>
</compile_context>

<pallas_src>
import functools

import jax
import jax.numpy as jnp
from jax.experimental import pallas as pl
from jax.experimental.pallas import tpu as pltpu


# ----------------------------------------------------------------------------
# Fused kernel: 1x1 conv (low res) -> dense bilinear resize -> softmax/argmax.
#   feat : (1, C, HWi)   f32   backbone features (NCHW, spatially flattened)
#   w    : (P, C)        f32   1x1 conv weight
#   b    : (P, 1)        f32   1x1 conv bias
#   kt   : (HWi, T_o)    f32   dense interpolation matrix tile (kron(Ah,Aw)^T)
#   probs: (1, P, T_o)   f32   softmax probabilities (lane-dense)
#   idx  : (1, 1, T_o)   i32   argmax channel index  (lane-dense)
# ----------------------------------------------------------------------------
def fused_head_kernel(feat_ref, w_ref, b_ref, kt_ref, probs_ref, idx_ref):
    # 1x1 conv at low resolution: (P, C) @ (C, HWi), K = C = 512 (MXU-friendly).
    logits = jnp.dot(w_ref[...], feat_ref[0],
                     preferred_element_type=jnp.float32) + b_ref[...]   # (P, HWi)

    # Bilinear resize of the P-channel logits as one lane-dense MXU dot.
    resized = jnp.dot(logits, kt_ref[...],
                      preferred_element_type=jnp.float32)               # (P, T_o)

    # Softmax over the channel (sublane) axis; exact divide for torch parity.
    m = jnp.max(resized, axis=0, keepdims=True)                         # (1, T_o)
    e = jnp.exp(resized - m)                                            # (P, T_o)
    s = jnp.sum(e, axis=0, keepdims=True)                               # (1, T_o)
    probs_ref[0] = e / s

    # Argmax over channels from logits (softmax is monotone); strict '>' keeps
    # the first maximum on ties, matching torch.argmax / torch.max.
    num_p = resized.shape[0]
    best = resized[0:1, :]
    idx = jnp.zeros(best.shape, jnp.int32)
    for p in range(1, num_p):
        row = resized[p:p + 1, :]
        gt = row > best
        idx = jnp.where(gt, p, idx)
        best = jnp.where(gt, row, best)
    idx_ref[0] = idx


def bilinear_matrix(out_size: int, in_size: int) -> jnp.ndarray:
    """Row-interpolation matrix matching F.interpolate(mode='bilinear',
    align_corners=False): out = M @ in along one spatial axis."""
    scale = in_size / out_size
    dst = jnp.arange(out_size, dtype=jnp.float32)
    src = (dst + 0.5) * scale - 0.5
    src = jnp.clip(src, 0.0, in_size - 1)              # clamp like PyTorch
    i0 = jnp.minimum(jnp.floor(src).astype(jnp.int32), in_size - 1)
    i1 = jnp.minimum(i0 + 1, in_size - 1)
    w1 = jnp.clip(src - i0.astype(jnp.float32), 0.0, 1.0)
    w0 = 1.0 - w1
    rows = jnp.arange(out_size)
    M = jnp.zeros((out_size, in_size), jnp.float32)
    M = M.at[rows, i0].add(w0)
    M = M.at[rows, i1].add(w1)
    return M


def _choose_out_tile(HWi: int, HWo: int, P: int) -> int:
    """Largest HWo tile (multiple of 128, divisor of HWo) whose double-buffered
    Kt/probs/idx VMEM blocks fit a conservative budget (v7x-safe)."""
    per_col = (HWi + P + 1) * 4 * 2          # f32, double-buffered
    budget = 8 * 1024 * 1024
    if HWo * per_col <= budget or HWo % 128 != 0:
        return HWo
    t = max(128, min(HWo, (budget // per_col) // 128 * 128))
    while HWo % t != 0:
        t -= 128
    return t


@functools.partial(jax.jit, static_argnames=("output_size",))
def mobilevitv2_head(last_hidden_state, conv_w, conv_b, output_size):
    """last_hidden_state: (B, C, Hin, Win) NCHW (as in PyTorch).
    conv_w: (P, C, 1, 1), conv_b: (P,).
    Returns (indices (B, Hout*Wout) int32, probs (B, Hout*Wout, P) float32)."""
    B, C, Hin, Win = last_hidden_state.shape
    Hout, Wout = output_size
    P = conv_w.shape[0]
    HWi = Hin * Win
    HWo = Hout * Wout

    feat = last_hidden_state.reshape(B, C, HWi).astype(jnp.float32)
    Wm = conv_w.reshape(P, C).astype(jnp.float32)
    bias = conv_b.reshape(P, 1).astype(jnp.float32)

    # Dense separable-bilinear matrix: resized(P, HWo) = logits(P, HWi) @ Kt.
    Ah = bilinear_matrix(Hout, Hin)            # (Hout, Hin)
    Aw = bilinear_matrix(Wout, Win)            # (Wout, Win)
    Kt = jnp.kron(Ah, Aw).T                    # (HWi, HWo)

    T_o = _choose_out_tile(HWi, HWo, P)
    n_ot = HWo // T_o

    probs3, idx3 = pl.pallas_call(
        fused_head_kernel,
        out_shape=(
            jax.ShapeDtypeStruct((B, P, HWo), jnp.float32),
            jax.ShapeDtypeStruct((B, 1, HWo), jnp.int32),
        ),
        grid_spec=pltpu.PrefetchScalarGridSpec(
            num_scalar_prefetch=0,
            grid=(B, n_ot),
            in_specs=[
                pl.BlockSpec((1, C, HWi), lambda b, t: (b, 0, 0)),   # features
                pl.BlockSpec((P, C), lambda b, t: (0, 0)),           # conv weight
                pl.BlockSpec((P, 1), lambda b, t: (0, 0)),           # conv bias
                pl.BlockSpec((HWi, T_o), lambda b, t: (0, t)),       # interp matrix
            ],
            out_specs=[
                pl.BlockSpec((1, P, T_o), lambda b, t: (b, 0, t)),   # probs
                pl.BlockSpec((1, 1, T_o), lambda b, t: (b, 0, t)),   # argmax idx
            ],
        ),
        compiler_params=pltpu.CompilerParams(
            dimension_semantics=("parallel", "parallel")),
    )(feat, Wm, bias, Kt)

    # Cheap wrapper rearranges on the tiny, lane-dense outputs.
    ems_map_indices = idx3.reshape(B, HWo)            # 'b h w -> b (h w)'
    ems_map_v = probs3.transpose(0, 2, 1)             # 'b p (h w) -> b (h w) p'
    return ems_map_indices, ems_map_v


if __name__ == "__main__":
    key = jax.random.PRNGKey(0)
    k_feat, k_w, k_b = jax.random.split(key, 3)

    # Shapes consistent with the module: backbone emits 512 channels,
    # 1x1 conv maps 512 -> 5 classes, output_size = (16, 16).
    B, C, Hin, Win = 2, 512, 8, 8
    P = 5
    output_size = (16, 16)
    Hout, Wout = output_size
    HWo = Hout * Wout

    last_hidden_state = jax.random.normal(k_feat, (B, C, Hin, Win), jnp.float32)
    conv_w = jax.random.normal(k_w, (P, C, 1, 1), jnp.float32) * 0.05
    conv_b = jax.random.normal(k_b, (P,), jnp.float32) * 0.05

    ems_map_indices, ems_map_v = mobilevitv2_head(
        last_hidden_state, conv_w, conv_b, output_size)
    jax.block_until_ready((ems_map_indices, ems_map_v))

    assert ems_map_indices.shape == (B, HWo)
    assert ems_map_v.shape == (B, HWo, P)

    # Pure-JAX reference in the PyTorch order: interpolate the 512-channel
    # features first, then 1x1 conv, softmax, argmax.
    Ah = bilinear_matrix(Hout, Hin)
    Aw = bilinear_matrix(Wout, Win)
    up = jnp.einsum('oh,bchw->bcow', Ah, last_hidden_state)
    up = jnp.einsum('pw,bcow->bcop', Aw, up)                       # (B,C,Hout,Wout)
    ref_logits = jnp.einsum('kc,bcop->bkop', conv_w.reshape(P, C), up) \
        + conv_b.reshape(1, P, 1, 1)
    ref_probs = jax.nn.softmax(ref_logits, axis=1)
    ref_idx = jnp.argmax(ref_logits, axis=1)
    ref_probs_flat = ref_probs.transpose(0, 2, 3, 1).reshape(B, HWo, P)
    ref_idx_flat = ref_idx.reshape(B, HWo).astype(jnp.int32)

    # softmax rows sum to 1 (exact divide), probabilities close to reference
    assert bool(jnp.all(jnp.abs(jnp.sum(ems_map_v, axis=-1) - 1.0) < 1e-4))
    assert float(jnp.max(jnp.abs(ems_map_v - ref_probs_flat))) < 1e-2
    # indices match wherever the reference top-2 margin is not razor thin
    top2 = jnp.sort(ref_logits, axis=1)[:, -2:, :, :]
    margin = (top2[:, 1] - top2[:, 0]).reshape(B, HWo)
    decided = margin > 0.05
    assert bool(jnp.all(jnp.where(decided, ems_map_indices == ref_idx_flat, True)))
    assert bool(jnp.all((ems_map_indices >= 0) & (ems_map_indices < P)))

    print("KERNEL_OK")
</pallas_src>

<mosaic_0001>
module attributes {stable_mosaic.version = 11 : i64} {
  func.func @fused_head_kernel(%arg0: i32, %arg1: i32, %arg2: memref<1x512x64xf32, #tpu.memory_space<vmem>>, %arg3: memref<5x512xf32, #tpu.memory_space<vmem>>, %arg4: memref<5x1xf32, #tpu.memory_space<vmem>>, %arg5: memref<64x256xf32, #tpu.memory_space<vmem>>, %arg6: memref<1x5x256xf32, #tpu.memory_space<vmem>>, %arg7: memref<1x1x256xi32, #tpu.memory_space<vmem>>) attributes {dimension_semantics = [#tpu.dimension_semantics<parallel>, #tpu.dimension_semantics<parallel>], iteration_bounds = array<i64: 2, 1>, scalar_prefetch = 0 : i64, scratch_operands = 0 : i64, tpu.core_type = #tpu.core_type<tc>, window_params = [{transform_indices = @transform_0, window_bounds = array<i64: 1, 512, 64>}, {pipeline_mode = #tpu.pipeline_mode<synchronous>, transform_indices = @transform_1, window_bounds = array<i64: 5, 512>}, {pipeline_mode = #tpu.pipeline_mode<synchronous>, transform_indices = @transform_2, window_bounds = array<i64: 5, 1>}, {transform_indices = @transform_3, window_bounds = array<i64: 64, 256>}, {transform_indices = @transform_4, window_bounds = array<i64: 1, 5, 256>}, {transform_indices = @transform_5, window_bounds = array<i64: 1, 1, 256>}]} {
    %c0 = arith.constant 0 : index
    %c0_0 = arith.constant 0 : index
    %0 = vector.load %arg3[%c0, %c0_0] : memref<5x512xf32, #tpu.memory_space<vmem>>, vector<5x512xf32>
    %c0_1 = arith.constant 0 : index
    %c0_2 = arith.constant 0 : index
    %c0_3 = arith.constant 0 : index
    %1 = vector.load %arg2[%c0_1, %c0_2, %c0_3] : memref<1x512x64xf32, #tpu.memory_space<vmem>>, vector<1x512x64xf32>
    %2 = vector.shape_cast %1 : vector<1x512x64xf32> to vector<512x64xf32>
    %cst = arith.constant dense<0.000000e+00> : vector<5x64xf32>
    %3 = tpu.matmul %0, %2, %cst {dimension_numbers = #tpu.dot_dimension_numbers<[1], [0], [0], [1], [0, 0, 1, 1], [], []>} : vector<5x512xf32>, vector<512x64xf32>, vector<5x64xf32> -> vector<5x64xf32>
    %c0_4 = arith.constant 0 : index
    %c0_5 = arith.constant 0 : index
    %4 = vector.load %arg4[%c0_4, %c0_5] : memref<5x1xf32, #tpu.memory_space<vmem>>, vector<5x1xf32>
    %5 = vector.broadcast %4 : vector<5x1xf32> to vector<5x64xf32>
    %6 = arith.addf %3, %5 : vector<5x64xf32>
    %c0_6 = arith.constant 0 : index
    %c0_7 = arith.constant 0 : index
    %7 = vector.load %arg5[%c0_6, %c0_7] : memref<64x256xf32, #tpu.memory_space<vmem>>, vector<64x256xf32>
    %cst_8 = arith.constant dense<0.000000e+00> : vector<5x256xf32>
    %8 = tpu.matmul %6, %7, %cst_8 {dimension_numbers = #tpu.dot_dimension_numbers<[1], [0], [0], [1], [0, 0, 1, 1], [], []>} : vector<5x64xf32>, vector<64x256xf32>, vector<5x256xf32> -> vector<5x256xf32>
    %cst_9 = arith.constant dense<0xFF800000> : vector<256xf32>
    %9 = vector.multi_reduction <maximumf>, %8, %cst_9 [0] : vector<5x256xf32> to vector<256xf32>
    %10 = vector.shape_cast %9 : vector<256xf32> to vector<1x256xf32>
    %11 = vector.broadcast %10 : vector<1x256xf32> to vector<5x256xf32>
    %12 = arith.subf %8, %11 : vector<5x256xf32>
    %13 = math.exp %12 : vector<5x256xf32>
    %cst_10 = arith.constant dense<0.000000e+00> : vector<256xf32>
    %14 = vector.multi_reduction <add>, %13, %cst_10 [0] : vector<5x256xf32> to vector<256xf32>
    %15 = vector.shape_cast %14 : vector<256xf32> to vector<1x256xf32>
    %16 = vector.broadcast %15 : vector<1x256xf32> to vector<5x256xf32>
    %17 = arith.divf %13, %16 : vector<5x256xf32>
    %c0_11 = arith.constant 0 : index
    %c0_12 = arith.constant 0 : index
    %c0_13 = arith.constant 0 : index
    %18 = vector.load %arg6[%c0_11, %c0_12, %c0_13] : memref<1x5x256xf32, #tpu.memory_space<vmem>>, vector<1x5x256xf32>
    %19 = vector.shape_cast %18 : vector<1x5x256xf32> to vector<5x256xf32>
    %20 = vector.shape_cast %17 : vector<5x256xf32> to vector<1x5x256xf32>
    tpu.vector_store %arg6[%c0_11, %c0_12, %c0_13], %20 {strides = array<i32>} : memref<1x5x256xf32, #tpu.memory_space<vmem>>, vector<1x5x256xf32>,
    %21 = vector.extract_strided_slice %8 {offsets = [0, 0], sizes = [1, 256], strides = [1, 1]} : vector<5x256xf32> to vector<1x256xf32>
    %c0_i32 = arith.constant 0 : i32
    %22 = vector.broadcast %c0_i32 : i32 to vector<1x256xi32>
    %23 = vector.extract_strided_slice %8 {offsets = [1, 0], sizes = [1, 256], strides = [1, 1]} : vector<5x256xf32> to vector<1x256xf32>
    %24 = arith.cmpf ogt, %23, %21 : vector<1x256xf32>
    %c1_i32 = arith.constant 1 : i32
    %25 = vector.broadcast %c1_i32 : i32 to vector<1x256xi32>
    %26 = arith.select %24, %25, %22 : vector<1x256xi1>, vector<1x256xi32>
    %27 = arith.select %24, %23, %21 : vector<1x256xi1>, vector<1x256xf32>
    %28 = vector.extract_strided_slice %8 {offsets = [2, 0], sizes = [1, 256], strides = [1, 1]} : vector<5x256xf32> to vector<1x256xf32>
    %29 = arith.cmpf ogt, %28, %27 : vector<1x256xf32>
    %c2_i32 = arith.constant 2 : i32
    %30 = vector.broadcast %c2_i32 : i32 to vector<1x256xi32>
    %31 = arith.select %29, %30, %26 : vector<1x256xi1>, vector<1x256xi32>
    %32 = arith.select %29, %28, %27 : vector<1x256xi1>, vector<1x256xf32>
    %33 = vector.extract_strided_slice %8 {offsets = [3, 0], sizes = [1, 256], strides = [1, 1]} : vector<5x256xf32> to vector<1x256xf32>
    %34 = arith.cmpf ogt, %33, %32 : vector<1x256xf32>
    %c3_i32 = arith.constant 3 : i32
    %35 = vector.broadcast %c3_i32 : i32 to vector<1x256xi32>
    %36 = arith.select %34, %35, %31 : vector<1x256xi1>, vector<1x256xi32>
    %37 = arith.select %34, %33, %32 : vector<1x256xi1>, vector<1x256xf32>
    %38 = vector.extract_strided_slice %8 {offsets = [4, 0], sizes = [1, 256], strides = [1, 1]} : vector<5x256xf32> to vector<1x256xf32>
    %39 = arith.cmpf ogt, %38, %37 : vector<1x256xf32>
    %c4_i32 = arith.constant 4 : i32
    %40 = vector.broadcast %c4_i32 : i32 to vector<1x256xi32>
    %41 = arith.select %39, %40, %36 : vector<1x256xi1>, vector<1x256xi32>
    %c0_14 = arith.constant 0 : index
    %c0_15 = arith.constant 0 : index
    %c0_16 = arith.constant 0 : index
    %42 = vector.load %arg7[%c0_14, %c0_15, %c0_16] : memref<1x1x256xi32, #tpu.memory_space<vmem>>, vector<1x1x256xi32>
    %43 = vector.shape_cast %42 : vector<1x1x256xi32> to vector<1x256xi32>
    %44 = vector.shape_cast %41 : vector<1x256xi32> to vector<1x1x256xi32>
    tpu.vector_store %arg7[%c0_14, %c0_15, %c0_16], %44 {strides = array<i32>} : memref<1x1x256xi32, #tpu.memory_space<vmem>>, vector<1x1x256xi32>,
    return
  }
  func.func @transform_0(%arg0: i32, %arg1: i32) -> (i32, i32, i32) {
    %c0_i32 = arith.constant 0 : i32
    %c0_i32_0 = arith.constant 0 : i32
    %c0_i32_1 = arith.constant 0 : i32
    return %arg0, %c0_i32, %c0_i32_0 : i32, i32, i32
  }
  func.func @transform_1(%arg0: i32, %arg1: i32) -> (i32, i32) {
    %c0_i32 = arith.constant 0 : i32
    %c0_i32_0 = arith.constant 0 : i32
    %c0_i32_1 = arith.constant 0 : i32
    return %c0_i32, %c0_i32_0 : i32, i32
  }
  func.func @transform_2(%arg0: i32, %arg1: i32) -> (i32, i32) {
    %c0_i32 = arith.constant 0 : i32
    %c0_i32_0 = arith.constant 0 : i32
    %c0_i32_1 = arith.constant 0 : i32
    return %c0_i32, %c0_i32_0 : i32, i32
  }
  func.func @transform_3(%arg0: i32, %arg1: i32) -> (i32, i32) {
    %c0_i32 = arith.constant 0 : i32
    %c0_i32_0 = arith.constant 0 : i32
    return %c0_i32, %arg1 : i32, i32
  }
  func.func @transform_4(%arg0: i32, %arg1: i32) -> (i32, i32, i32) {
    %c0_i32 = arith.constant 0 : i32
    %c0_i32_0 = arith.constant 0 : i32
    return %arg0, %c0_i32, %arg1 : i32, i32, i32
  }
  func.func @transform_5(%arg0: i32, %arg1: i32) -> (i32, i32, i32) {
    %c0_i32 = arith.constant 0 : i32
    %c0_i32_0 = arith.constant 0 : i32
    return %arg0, %c0_i32, %arg1 : i32, i32, i32
  }
}

</mosaic_0001>

<bundles_post_ra>
// kernel: mobilevitv2_head.1
= control target key start
LH: loop header
LB: loop body
LE: loop exit
PB: predicated region body
PF: predicated region fallthrough
CT: control target
= control target key end

     0   :  { %s880_s18 = smov 0   ;;  %s882_s19 = smov 0   ;;  %s1057_s0 = inlined_call_operand.vmem [shape: f32[2,512,64], index: 0, kind: input, shape index: {}]   ;;  %s1058_s1 = inlined_call_operand.vmem [shape: f32[5,512], index: 1, kind: input, shape index: {}]   ;;  %s1059_s2 = inlined_call_operand.vmem [shape: f32[5,1], index: 2, kind: input, shape index: {}]   ;;  %s1060_s3 = inlined_call_operand.vmem [shape: f32[64,256], index: 3, kind: input, shape index: {}]   ;;  %s1061_s4 = inlined_call_operand.vmem [shape: f32[2,5,256], index: 4, kind: output, shape index: {0}]   ;;  %s1062_s5 = inlined_call_operand.vmem [shape: s32[2,1,256], index: 5, kind: output, shape index: {1}]  }
   0x1   :  { %s884_s20 = smov 0  }
   0x2 LB: > { %s28_s21 = sadd.s32 1, %s843_s19  ;;  %p779_p0 = scmp.ge.s32.totalorder %s847_s20, 1  ;;  %s847_s20 = sphi %s884_s20, %s16_s20   ;;  %s843_s19 = sphi %s882_s19, %s1064_s19   ;;  %s839_s18 = sphi %s880_s18, %s1063_s18  }
   0x3   : > { %p30_p1 = scmp.ge.s32.totalorder %s28_s21, 2  ;;  %p217_p2 = scmp.lt.s32.totalorder %s847_s20, 3 }
   0x5   : > { %s1066_s21 = smov (%p30_p1, %s28_s21), 0  ;;  %p218_p3 = pnand %p779_p0, %p217_p2 }
   0x6   : > { %p262_p4 = scmp.lt.s32.totalorder (!%p218_p3), %s839_s18, 1 }
   0x7   : > { %221 = sbr.rel (%p218_p3) target bundleno = 368 (0x170), region = 36 }
   0xc   : > { %s1068_s18 = smov (!%p262_p4, %s839_s18), 1  ;;  %v294_v62 = vld [vmem:[%s1058_s1 + $0x10] sm:$0x1f]  ;;  %vm462_vm0 = vcmask 523264   ;;  %vm506_vm1 = vcmask 1044480  }
   0xd   : > { %s789_s22 = sshll.u32 %s1068_s18, 9  ;;  %s784_s26 = sshll.u32 %s1068_s18, 1 }
   0xe   : > { %s904_s25 = scalar_lea.vmem %s1057_s0, %s789_s22  ;;  %s290_s29 = scalar_lea.vmem %s1062_s5, %s784_s26 }
   0xf   : > { %v343_v0 = vld [vmem:[%s904_s25 + $0x178] sm:$0xff]  ;;  %v342_v2 = vld [vmem:[%s904_s25 + $0x170] sm:$0xff]  ;;  %v341_v6 = vld [vmem:[%s904_s25 + $0x168] sm:$0xff]  ;;  %s790_s30 = sshll.u32 %s1068_s18, 4 }
  0x10   : > { %v311_v1 = vld [vmem:[%s904_s25 + $0x78] sm:$0xff]  ;;  %406 = vmatpush.msra.mxu2 %v343_v0  ;;  %v310_v4 = vld [vmem:[%s904_s25 + $0x70] sm:$0xff]  ;;  %v309_v8 = vld [vmem:[%s904_s25 + $0x68] sm:$0xff]  ;;  %s281_s8 = scalar_lea.vmem %s1061_s4, %s790_s30 }
  0x11   : > { %366 = vmatpush.msra.mxu0 %v311_v1  ;;  %v359_v3 = vld [vmem:[%s904_s25 + $0x1f8] sm:$0xff]  ;;  %v358_v7 = vld [vmem:[%s904_s25 + $0x1f0] sm:$0xff]  ;;  %v357_v10 = vld [vmem:[%s904_s25 + $0x1e8] sm:$0xff] }
  0x12   : > { %v327_v5 = vld [vmem:[%s904_s25 + $0xf8] sm:$0xff]  ;;  %426 = vmatpush.msra.mxu3 %v359_v3  ;;  %407 = vmatpush.msra.mxu2 %v342_v2  ;;  %v326_v9 = vld [vmem:[%s904_s25 + $0xf0] sm:$0xff]  ;;  %v340_v11 = vld [vmem:[%s904_s25 + $0x160] sm:$0xff] }
  0x13   : > { %386 = vmatpush.msra.mxu1 %v327_v5  ;;  %367 = vmatpush.msra.mxu0 %v310_v4  ;;  %v308_v12 = vld [vmem:[%s904_s25 + $0x60] sm:$0xff]  ;;  %v325_v13 = vld [vmem:[%s904_s25 + $0xe8] sm:$0xff]  ;;  %v339_v16 = vld [vmem:[%s904_s25 + $0x158] sm:$0xff] }
  0x14   : > { %427 = vmatpush.msra.mxu3 %v358_v7  ;;  %408 = vmatpush.msra.mxu2 %v341_v6  ;;  %v356_v14 = vld [vmem:[%s904_s25 + $0x1e0] sm:$0xff]  ;;  %v307_v17 = vld [vmem:[%s904_s25 + $0x58] sm:$0xff]  ;;  %v338_v20 = vld [vmem:[%s904_s25 + $0x150] sm:$0xff]  ;;  %v849_v7 = vmov 0  }
  0x15   : > { %387 = vmatpush.msra.mxu1 %v326_v9  ;;  %368 = vmatpush.msra.mxu0 %v309_v8  ;;  %v324_v15 = vld [vmem:[%s904_s25 + $0xe0] sm:$0xff]  ;;  %v355_v18 = vld [vmem:[%s904_s25 + $0x1d8] sm:$0xff]  ;;  %v306_v21 = vld [vmem:[%s904_s25 + $0x50] sm:$0xff] }
  0x16   : > { %428 = vmatpush.msra.mxu3 %v357_v10  ;;  %409 = vmatpush.msra.mxu2 %v340_v11  ;;  %v323_v19 = vld [vmem:[%s904_s25 + $0xd8] sm:$0xff]  ;;  %v354_v22 = vld [vmem:[%s904_s25 + $0x1d0] sm:$0xff]  ;;  %v337_v24 = vld [vmem:[%s904_s25 + $0x148] sm:$0xff] }
  0x17   : > { %388 = vmatpush.msra.mxu1 %v325_v13  ;;  %369 = vmatpush.msra.mxu0 %v308_v12  ;;  %v322_v23 = vld [vmem:[%s904_s25 + $0xd0] sm:$0xff]  ;;  %v305_v25 = vld [vmem:[%s904_s25 + $0x48] sm:$0xff]  ;;  %v336_v28 = vld [vmem:[%s904_s25 + $0x140] sm:$0xff] }
  0x18   : > { %429 = vmatpush.msra.mxu3 %v356_v14  ;;  %410 = vmatpush.msra.mxu2 %v339_v16  ;;  %v353_v26 = vld [vmem:[%s904_s25 + $0x1c8] sm:$0xff]  ;;  %v304_v29 = vld [vmem:[%s904_s25 + $0x40] sm:$0xff]  ;;  %v335_v32 = vld [vmem:[%s904_s25 + $0x138] sm:$0xff] }
  0x19   : > { %389 = vmatpush.msra.mxu1 %v324_v15  ;;  %370 = vmatpush.msra.mxu0 %v307_v17  ;;  %v321_v27 = vld [vmem:[%s904_s25 + $0xc8] sm:$0xff]  ;;  %v352_v30 = vld [vmem:[%s904_s25 + $0x1c0] sm:$0xff]  ;;  %v303_v33 = vld [vmem:[%s904_s25 + $0x38] sm:$0xff] }
  0x1a   : > { %430 = vmatpush.msra.mxu3 %v355_v18  ;;  %411 = vmatpush.msra.mxu2 %v338_v20  ;;  %v320_v31 = vld [vmem:[%s904_s25 + $0xc0] sm:$0xff]  ;;  %v351_v34 = vld [vmem:[%s904_s25 + $0x1b8] sm:$0xff]  ;;  %v334_v36 = vld [vmem:[%s904_s25 + $0x130] sm:$0xff] }
  0x1b   : > { %390 = vmatpush.msra.mxu1 %v323_v19  ;;  %371 = vmatpush.msra.mxu0 %v306_v21  ;;  %v319_v35 = vld [vmem:[%s904_s25 + $0xb8] sm:$0xff]  ;;  %v302_v37 = vld [vmem:[%s904_s25 + $0x30] sm:$0xff]  ;;  %v333_v40 = vld [vmem:[%s904_s25 + $0x128] sm:$0xff] }
  0x1c   : > { %431 = vmatpush.msra.mxu3 %v354_v22  ;;  %412 = vmatpush.msra.mxu2 %v337_v24  ;;  %v350_v38 = vld [vmem:[%s904_s25 + $0x1b0] sm:$0xff]  ;;  %v301_v41 = vld [vmem:[%s904_s25 + $0x28] sm:$0xff]  ;;  %v332_v44 = vld [vmem:[%s904_s25 + $0x120] sm:$0xff] }
  0x1d   : > { %391 = vmatpush.msra.mxu1 %v322_v23  ;;  %372 = vmatpush.msra.mxu0 %v305_v25  ;;  %v318_v39 = vld [vmem:[%s904_s25 + $0xb0] sm:$0xff]  ;;  %v349_v42 = vld [vmem:[%s904_s25 + $0x1a8] sm:$0xff]  ;;  %v300_v45 = vld [vmem:[%s904_s25 + $0x20] sm:$0xff] }
  0x1e   : > { %432 = vmatpush.msra.mxu3 %v353_v26  ;;  %413 = vmatpush.msra.mxu2 %v336_v28  ;;  %v317_v43 = vld [vmem:[%s904_s25 + $0xa8] sm:$0xff]  ;;  %v348_v46 = vld [vmem:[%s904_s25 + $0x1a0] sm:$0xff]  ;;  %v331_v48 = vld [vmem:[%s904_s25 + $0x118] sm:$0xff] }
  0x1f   : > { %392 = vmatpush.msra.mxu1 %v321_v27  ;;  %373 = vmatpush.msra.mxu0 %v304_v29  ;;  %v316_v47 = vld [vmem:[%s904_s25 + $0xa0] sm:$0xff]  ;;  %v299_v49 = vld [vmem:[%s904_s25 + $0x18] sm:$0xff]  ;;  %v330_v52 = vld [vmem:[%s904_s25 + $0x110] sm:$0xff] }
  0x20   : > { %433 = vmatpush.msra.mxu3 %v352_v30  ;;  %414 = vmatpush.msra.mxu2 %v335_v32  ;;  %v347_v50 = vld [vmem:[%s904_s25 + $0x198] sm:$0xff]  ;;  %v298_v53 = vld [vmem:[%s904_s25 + $0x10] sm:$0xff]  ;;  %v329_v56 = vld [vmem:[%s904_s25 + $0x108] sm:$0xff] }
  0x21   : > { %393 = vmatpush.msra.mxu1 %v320_v31  ;;  %374 = vmatpush.msra.mxu0 %v303_v33  ;;  %v315_v51 = vld [vmem:[%s904_s25 + $0x98] sm:$0xff]  ;;  %v346_v54 = vld [vmem:[%s904_s25 + $0x190] sm:$0xff]  ;;  %v297_v57 = vld [vmem:[%s904_s25 + $0x8] sm:$0xff] }
  0x22   : > { %434 = vmatpush.msra.mxu3 %v351_v34  ;;  %415 = vmatpush.msra.mxu2 %v334_v36  ;;  %v314_v55 = vld [vmem:[%s904_s25 + $0x90] sm:$0xff]  ;;  %v345_v58 = vld [vmem:[%s904_s25 + $0x188] sm:$0xff]  ;;  %v328_v60 = vld [vmem:[%s904_s25 + $0x100] sm:$0xff] }
  0x23   : > { %394 = vmatpush.msra.mxu1 %v319_v35  ;;  %375 = vmatpush.msra.mxu0 %v302_v37  ;;  %v313_v59 = vld [vmem:[%s904_s25 + $0x88] sm:$0xff]  ;;  %v296_v61 = vld [vmem:[%s904_s25] sm:$0xff]  ;;  %v295_v1 = vld [vmem:[%s1058_s1 + $0x18] sm:$0x1f] }
  0x24   : > { %435 = vmatpush.msra.mxu3 %v350_v38  ;;  %416 = vmatpush.msra.mxu2 %v333_v40  ;;  %v344_v63 = vld [vmem:[%s904_s25 + $0x180] sm:$0xff]  ;;  %v293_v3 = vld [vmem:[%s1058_s1 + $0x8] sm:$0x1f]  ;;  %v460_v5 = vld [vmem:[%s1060_s3 + $0x70] sm:$0xff] }
  0x25   : > { %395 = vmatpush.msra.mxu1 %v318_v39  ;;  %376 = vmatpush.msra.mxu0 %v301_v41  ;;  %v292_v0 = vld [vmem:[%s1058_s1] sm:$0x1f]  ;;  %v461_v6 = vld [vmem:[%s1060_s3 + $0x78] sm:$0xff]  ;;  %v459_v9 = vld [vmem:[%s1060_s3 + $0x68] sm:$0xff] }
  0x26   : > { %436 = vmatpush.msra.mxu3 %v349_v42  ;;  %417 = vmatpush.msra.mxu2 %v332_v44  ;;  %v312_v2 = vld [vmem:[%s904_s25 + $0x80] sm:$0xff]  ;;  %v456_v10 = vld [vmem:[%s1060_s3 + $0x50] sm:$0xff]  ;;  %v457_v11 = vld [vmem:[%s1060_s3 + $0x58] sm:$0xff] }
  0x27   : > { %396 = vmatpush.msra.mxu1 %v317_v43  ;;  %377 = vmatpush.msra.mxu0 %v300_v45  ;;  %v360_v4 = vld [vmem:[%s1059_s2] sm:$0x1f]  ;;  %v455_v13 = vld [vmem:[%s1060_s3 + $0x48] sm:$0xff]  ;;  %v452_v14 = vld [vmem:[%s1060_s3 + $0x30] sm:$0xff] }
  0x28   : > { %437 = vmatpush.msra.mxu3 %v348_v46  ;;  %418 = vmatpush.msra.mxu2 %v331_v48  ;;  %v458_v8 = vld [vmem:[%s1060_s3 + $0x60] sm:$0xff]  ;;  %v453_v15 = vld [vmem:[%s1060_s3 + $0x38] sm:$0xff]  ;;  %v451_v17 = vld [vmem:[%s1060_s3 + $0x28] sm:$0xff] }
  0x29   : > { %397 = vmatpush.msra.mxu1 %v316_v47  ;;  %378 = vmatpush.msra.mxu0 %v299_v49  ;;  %v454_v12 = vld [vmem:[%s1060_s3 + $0x40] sm:$0xff]  ;;  %v448_v18 = vld [vmem:[%s1060_s3 + $0x10] sm:$0xff]  ;;  %v449_v19 = vld [vmem:[%s1060_s3 + $0x18] sm:$0xff] }
  0x2a   : > { %438 = vmatpush.msra.mxu3 %v347_v50  ;;  %419 = vmatpush.msra.mxu2 %v330_v52  ;;  %v450_v16 = vld [vmem:[%s1060_s3 + $0x20] sm:$0xff]  ;;  %v447_v21 = vld [vmem:[%s1060_s3 + $0x8] sm:$0xff] }
  0x2b   : > { %398 = vmatpush.msra.mxu1 %v315_v51  ;;  %379 = vmatpush.msra.mxu0 %v298_v53  ;;  %v446_v20 = vld [vmem:[%s1060_s3] sm:$0xff] }
  0x2c   : > { %439 = vmatpush.msra.mxu3 %v346_v54  ;;  %420 = vmatpush.msra.mxu2 %v329_v56 }
  0x2d   : > { %399 = vmatpush.msra.mxu1 %v314_v55  ;;  %380 = vmatpush.msra.mxu0 %v297_v57 }
  0x2e   : > { %440 = vmatpush.msra.mxu3 %v345_v58  ;;  %421 = vmatpush.msra.mxu2 %v328_v60 }
  0x2f   : > { %400 = vmatpush.msra.mxu1 %v313_v59  ;;  %381 = vmatpush.msra.mxu0 %v296_v61 }
  0x30   : > { %422 = vmatmul.f32.vlgmr.msra.gmra.mxu2 %v294_v62  ;;  %441 = vmatpush.msra.mxu3 %v344_v63 }
  0x31   : > { %382 = vmatmul.f32.vlgmr.msra.gmra.mxu0 %v292_v0  ;;  %442 = vmatmul.f32.vlgmr.msra.gmra.mxu3 %v295_v1 }
  0x32   : > { %401 = vmatpush.msra.mxu1 %v312_v2  ;;  %816 = vset.pattern.permute.xlu0 %v849_v7 }
  0x33   : > { %402 = vmatmul.f32.vlgmr.msra.gmra.mxu1 %v293_v3  ;;  %363 = vperm.xlu0 %816, %v360_v4  }
  0x34   : > { %474 = vmatpush.msrb.mxu0 %v460_v5  ;;  %494 = vmatpush.msrb.mxu1 %v461_v6 }
  0x36   : > { %475 = vmatpush.msrb.mxu0 %v458_v8  ;;  %495 = vmatpush.msrb.mxu1 %v459_v9 }
  0x38   : > { %476 = vmatpush.msrb.mxu0 %v456_v10  ;;  %496 = vmatpush.msrb.mxu1 %v457_v11 }
  0x3a   : > { %477 = vmatpush.msrb.mxu0 %v454_v12  ;;  %497 = vmatpush.msrb.mxu1 %v455_v13 }
  0x3c   : > { %478 = vmatpush.msrb.mxu0 %v452_v14  ;;  %498 = vmatpush.msrb.mxu1 %v453_v15  ;;  %v629_v15 = vlaneseq }
  0x3e   : > { %479 = vmatpush.msrb.mxu0 %v450_v16  ;;  %499 = vmatpush.msrb.mxu1 %v451_v17  ;;  %vm631_vm10 = vcmp.lt.s32.totalorder %v629_v15, 256 }
  0x40   : > { %480 = vmatpush.msrb.mxu0 %v448_v18  ;;  %500 = vmatpush.msrb.mxu1 %v449_v19 }
  0x42   : > { %481 = vmatpush.msrb.mxu0 %v446_v20  ;;  %501 = vmatpush.msrb.mxu1 %v447_v21 }
  0xa5   : > { %v364_v22 = vpop.permute.xlu0 %363 }
  0xae   : > { %v383_v23 = vpop.f32.mrf.mxu0 }
  0xaf   : > { %v384_v24 = vadd.f32 %v383_v23, %v364_v22 }
  0xb0   : > { %v403_v25 = vpop.f32.mrf.mxu1 }
  0xb1   : > { %v404_v26 = vadd.f32 %v403_v25, %v384_v24 }
  0xb3   : > { %v423_v27 = vpop.f32.mrf.mxu2 }
  0xb4   : > { %v424_v28 = vadd.f32 %v423_v27, %v404_v26  ;;  %v443_v29 = vpop.f32.mrf.mxu3 }
  0xb6   : > { %v444_v30 = vadd.f32 %v443_v29, %v424_v28 }
  0xb8   : > { %785 = vmatmul.msk.f32.vlgmr.msrb.gmra.mxu0 %vm462_vm0, %v444_v30  ;;  %786 = vmatmul.msk.f32.vlgmr.msrb.gmra.mxu1 %vm462_vm0, %v444_v30 }
 0x135   : > { %v483_v31 = vpop.f32.mrf.mxu0  ;;  %v503_v32 = vpop.f32.mrf.mxu1 }
 0x136   : > { %v507_v33 = vsel %vm506_vm1, %v483_v31, -inf  ;;  %v575_v34 = vrot.slane %v483_v31, 7  ;;  %v514_v35 = vsel %vm506_vm1, %v503_v32, -inf  ;;  %v576_v36 = vrot.slane %v503_v32, 7 }
 0x137   : > { %v508_v37 = vrot.slane %v507_v33, 4  ;;  %v515_v38 = vrot.slane %v514_v35, 4 }
 0x138   : > { %vm579_vm2 = vcmp.gt.f32.partialorder %v483_v31, %v575_v34  ;;  %vm580_vm3 = vcmp.gt.f32.partialorder %v503_v32, %v576_v36 }
 0x139   : > { %v509_v39 = vmax.f32 %v507_v33, %v508_v37  ;;  %v581_v40 = vsel %vm579_vm2, 1, %v849_v7  ;;  %v583_v41 = vsel %vm579_vm2, %v483_v31, %v575_v34  ;;  %v516_v42 = vmax.f32 %v514_v35, %v515_v38 }
 0x13a   : > { %v587_v43 = vrot.slane %v583_v41, 7  ;;  %v593_v44 = vrot.slane %v581_v40, 7  ;;  %v582_v45 = vsel %vm580_vm3, 1, %v849_v7  ;;  %v584_v46 = vsel %vm580_vm3, %v503_v32, %v576_v36 }
 0x13b   : > { %v510_v47 = vrot.slane %v509_v39, 2  ;;  %v517_v48 = vrot.slane %v516_v42, 2  ;;  %v588_v49 = vrot.slane %v584_v46, 7  ;;  %v594_v50 = vrot.slane %v582_v45, 7 }
 0x13c   : > { %vm591_vm4 = vcmp.gt.f32.partialorder %v483_v31, %v587_v43 }
 0x13d   : > { %v511_v51 = vmax.f32 %v509_v39, %v510_v47  ;;  %v595_v52 = vsel %vm591_vm4, 2, %v593_v44  ;;  %v597_v53 = vsel %vm591_vm4, %v483_v31, %v587_v43  ;;  %v518_v54 = vmax.f32 %v516_v42, %v517_v48 }
 0x13e   : > { %v601_v55 = vrot.slane %v597_v53, 7  ;;  %v607_v56 = vrot.slane %v595_v52, 7  ;;  %vm592_vm5 = vcmp.gt.f32.partialorder %v503_v32, %v588_v49 }
 0x13f   : > { %v512_v57 = vrot.slane %v511_v51, 1  ;;  %v519_v58 = vrot.slane %v518_v54, 1  ;;  %v596_v59 = vsel %vm592_vm5, 2, %v594_v50  ;;  %v598_v60 = vsel %vm592_vm5, %v503_v32, %v588_v49 }
 0x140   : > { %vm605_vm6 = vcmp.gt.f32.partialorder %v483_v31, %v601_v55  ;;  %v602_v61 = vrot.slane %v598_v60, 7  ;;  %v608_v62 = vrot.slane %v596_v59, 7 }
 0x141   : > { %v513_v63 = vmax.f32 %v511_v51, %v512_v57  ;;  %v609_v0 = vsel %vm605_vm6, 3, %v607_v56  ;;  %v611_v1 = vsel %vm605_vm6, %v483_v31, %v601_v55  ;;  %v520_v2 = vmax.f32 %v518_v54, %v519_v58 }
 0x142   : > { %v615_v3 = vrot.slane %v611_v1, 7  ;;  %v621_v4 = vrot.slane %v609_v0, 7  ;;  %vm606_vm7 = vcmp.gt.f32.partialorder %v503_v32, %v602_v61 }
 0x143   : > { %v521_v5 = vsub.f32 %v483_v31, %v513_v63  ;;  %v522_v6 = vsub.f32 %v503_v32, %v520_v2  ;;  %v610_v7 = vsel %vm606_vm7, 3, %v608_v62  ;;  %v612_v8 = vsel %vm606_vm7, %v503_v32, %v602_v61 }
 0x144   : > { %vm619_vm8 = vcmp.gt.f32.partialorder %v483_v31, %v615_v3  ;;  %v616_v9 = vrot.slane %v612_v8, 7  ;;  %v622_v10 = vrot.slane %v610_v7, 7 }
 0x145   : > { %v523_v11 = vmul.f32 1.442695, %v521_v5  ;;  %v623_v12 = vsel %vm619_vm8, 4, %v621_v4  ;;  %v525_v13 = vmul.f32 1.442695, %v522_v6 }
 0x146   : > { %625 = vst [vmem:[#allocation1] sm:$0xff] %v623_v12  ;;  %vm620_vm9 = vcmp.gt.f32.partialorder %v503_v32, %v616_v9 }
 0x147   : > { %817 = vpow2.f32 %v523_v11  ;;  %v624_v14 = vsel %vm620_vm9, 4, %v622_v10 }
 0x148   : > { %819 = vpow2.f32 %v525_v13  ;;  %626 = vst [vmem:[#allocation1 + $0x9] sm:$0xff] %v624_v14 }
 0x14d   : > { %v818_v16 = vpop.eup %817 }
 0x14e   : > { %v820_v17 = vpop.eup %819  ;;  %v527_v18 = vsel %vm506_vm1, %v818_v16, 0.0 }
 0x14f   : > { %v528_v19 = vrot.slane %v527_v18, 4  ;;  %v534_v20 = vsel %vm506_vm1, %v820_v17, 0.0  ;;  %v628_v21 = vld [vmem:[#allocation1 + $0x4] ss:$9 sm:$0xff] }
 0x150   : > { %v535_v22 = vrot.slane %v534_v20, 4  ;;  %633 = vst.msk [vmem:[%s290_s29] sm:$0x3] %vm631_vm10, %v628_v21 }
 0x151   : > { %v529_v23 = vadd.f32 %v528_v19, %v527_v18 }
 0x152   : > { %v536_v24 = vadd.f32 %v535_v22, %v534_v20 }
 0x153   : > { %v530_v25 = vrot.slane %v529_v23, 2 }
 0x154   : > { %v537_v26 = vrot.slane %v536_v24, 2 }
 0x155   : > { %v531_v27 = vadd.f32 %v530_v25, %v529_v23 }
 0x156   : > { %v538_v28 = vadd.f32 %v537_v26, %v536_v24 }
 0x157   : > { %v532_v29 = vrot.slane %v531_v27, 1 }
 0x158   : > { %v539_v30 = vrot.slane %v538_v28, 1 }
 0x159   : > { %v533_v31 = vadd.f32 %v532_v29, %v531_v27 }
 0x15a   : > { %v540_v32 = vadd.f32 %v539_v30, %v538_v28 }
 0x15b   : > { %821 = vrcp.f32 %v533_v31  ;;  %v552_v38 = vand.u32 2147483648, %v533_v31  ;;  %v550_v41 = vand.u32 2147483647, %v533_v31  ;;  %vm546_vm13 = vweird.f32 %v533_v31 }
 0x15c   : > { %823 = vrcp.f32 %v540_v32  ;;  %v567_v42 = vand.u32 2147483648, %v540_v32  ;;  %v565_v44 = vand.u32 2147483647, %v540_v32  ;;  %vm561_vm15 = vweird.f32 %v540_v32 }
 0x15d   : > { %v553_v46 = vor.u32 1.1754944e-38, %v552_v38  ;;  %vm551_vm0 = vcmp.eq.f32.partialorder %v550_v41, 8.507059e+37 }
 0x15e   : > { %v568_v49 = vor.u32 1.1754944e-38, %v567_v42  ;;  %vm566_vm2 = vcmp.eq.f32.partialorder %v565_v44, 8.507059e+37 }
 0x161   : > { %v822_v33 = vpop.eup %821 }
 0x162   : > { %v824_v34 = vpop.eup %823  ;;  %v542_v35 = vmul.f32 %v822_v33, %v533_v31  ;;  %vm547_vm11 = vweird.f32 %v822_v33 }
 0x163   : > { %v557_v36 = vmul.f32 %v824_v34, %v540_v32  ;;  %vm562_vm12 = vweird.f32 %v824_v34  ;;  %vm548_vm14 = vmor %vm546_vm13, %vm547_vm11 }
 0x164   : > { %v543_v37 = vsub.f32 1.0, %v542_v35  ;;  %vm563_vm1 = vmor %vm561_vm15, %vm562_vm12 }
 0x165   : > { %v558_v39 = vsub.f32 1.0, %v557_v36 }
 0x166   : > { %v544_v40 = vmul.f32 %v822_v33, %v543_v37 }
 0x167   : > { %v559_v43 = vmul.f32 %v824_v34, %v558_v39 }
 0x168   : > { %v545_v45 = vadd.f32 %v822_v33, %v544_v40 }
 0x169   : > { %v560_v47 = vadd.f32 %v824_v34, %v559_v43 }
 0x16a   : > { %v549_v48 = vsel %vm548_vm14, %v822_v33, %v545_v45 }
 0x16b   : > { %v554_v50 = vsel %vm551_vm0, %v553_v46, %v549_v48  ;;  %v564_v51 = vsel %vm563_vm1, %v824_v34, %v560_v47 }
 0x16c   : > { %v555_v52 = vmul.f32 %v818_v16, %v554_v50  ;;  %v569_v53 = vsel %vm566_vm2, %v568_v49, %v564_v51 }
 0x16d   : > { %v570_v54 = vmul.f32 %v820_v17, %v569_v53 }
 0x16e   : > { %571 = vst [vmem:[%s281_s8] sm:$0x1f] %v555_v52 }
 0x16f   : > { %572 = vst [vmem:[%s281_s8 + $0x8] sm:$0x1f] %v570_v54 }
 0x170 PF: > { %s16_s20 = sadd.s32 1, %s847_s20   ;;  %s1063_s18 = smov %s843_s19 }
 0x171   : > { %p13_p5 = scmp.ge.s32.totalorder %s16_s20, 4   ;;  %s1064_s19 = smov %s1066_s21 }
 0x173   :  { %15 = sbr.rel (!%p13_p5) target bundleno = 2 (0x2), region = 82 }

</bundles_post_ra>
